<compile_context>
chip_gen: v7x
topology: tpu7x:2x2x1
jax: 0.10.0
libtpu: 0.0.40
codegen_flags: <defaults>
</compile_context>

<pallas_src>
import functools

import numpy as np
import jax
import jax.numpy as jnp
from jax.experimental import pallas as pl
from jax.experimental.pallas import tpu as pltpu


# TODO(synk): ComputeLossWeights source was not provided; reproduced here as a
# deterministic class-balanced ("effective number of samples") weighting.
def compute_loss_weights(beta=0.9, samples_per_class=(10, 25, 40, 60)):
    n = np.asarray(samples_per_class, dtype=np.float64)
    eff = 1.0 - np.power(beta, n)
    w = (1.0 - beta) / eff
    w = w / w.sum() * len(n)          # normalize so weights sum to C
    return np.asarray(w, dtype=np.float32)


def _wbce_kernel(x_ref, t_ref, w_ref, o_ref, acc_ref, *, inv_n, single_log):
    # Zero the block-shaped accumulator at the start of each core's row range.
    @pl.when(pl.program_id(1) == 0)
    def _():
        acc_ref[...] = jnp.zeros_like(acc_ref)

    # In-kernel cast: inputs/targets stream from HBM in their native dtype.
    x = x_ref[...].astype(jnp.float32)          # (TR, L) probabilities
    t = t_ref[...].astype(jnp.float32)          # (TR, L) targets
    w = w_ref[...]                              # (1, L) f32, broadcasts over rows

    if single_log:
        # Only exact for strictly-binary targets; halves EUP (log) work.
        p = jnp.where(t > 0.5, x, 1.0 - x)
        per_elem = -w * jnp.maximum(jnp.log(p), -100.0)
    else:
        # PyTorch binary_cross_entropy clamps log terms at -100.
        log_x = jnp.maximum(jnp.log(x), -100.0)
        log_1mx = jnp.maximum(jnp.log(1.0 - x), -100.0)
        per_elem = -w * (t * log_x + (1.0 - t) * log_1mx)

    # Pure elementwise (VPU) accumulation every step; no per-step XLU reduction.
    acc_ref[...] += per_elem

    # Finalize: one cross-lane reduction per core, lane-dense full-block store.
    @pl.when(pl.program_id(1) == pl.num_programs(1) - 1)
    def _():
        total = jnp.sum(acc_ref[...]) * inv_n
        o_ref[...] = jnp.zeros_like(o_ref) + total


def _pick_lane_width(n_total, n_classes):
    """Lane width L: multiple of 128 (lane-dense) AND of C (preserves w[i % C]),
    and evenly dividing N."""
    base = int(np.lcm(n_classes, 128))
    for lane in (512, 1024, 2048, 4096, 256, 128):
        if lane % base == 0 and n_total % lane == 0:
            return lane
    if n_total % base == 0:
        return base
    return n_classes          # narrow fallback: still correct, just slower


def _pick_tile_rows(rows, lane, min_sublane=8, target_elems=512 * 1024):
    """Largest row tile (multiple of min_sublane) dividing `rows` with
    ~<= 2 MiB of f32 elements per tile; else take the whole row range."""
    for tr in (8192, 4096, 2048, 1024, 512, 256, 128, 64, 32, 16, 8):
        if tr % min_sublane == 0 and rows % tr == 0 and tr * lane <= target_elems:
            return tr
    return rows


def weighted_bce_loss(inputs, targets, weights, single_log=False):
    """inputs, targets: any shape (flattened); weights: (C,) class weights."""
    C = int(np.shape(weights)[0])
    x = inputs.reshape(-1)
    t = targets.reshape(-1)
    if not jnp.issubdtype(t.dtype, jnp.floating):
        t = t.astype(x.dtype)
    N = int(x.shape[0])
    assert N % C == 0, "total element count must be divisible by len(weights)"

    L = _pick_lane_width(N, C)
    rows = N // L
    x2 = x.reshape(rows, L)
    t2 = t.reshape(rows, L)
    # Pre-tile weight row: w2[0, j] == weights[j % C]; since L % C == 0 the flat
    # element at index r*L + j still gets weights[(r*L + j) % C].
    w2 = jnp.tile(jnp.asarray(weights, jnp.float32).reshape(-1), L // C).reshape(1, L)

    # Sublane granularity depends on the narrowest streamed dtype.
    min_itemsize = min(np.dtype(x2.dtype).itemsize, np.dtype(t2.dtype).itemsize)
    min_sublane = {4: 8, 2: 16, 1: 32}.get(int(min_itemsize), 8)

    tile_rows = _pick_tile_rows(rows, L, min_sublane=min_sublane)
    blocks = rows // tile_rows
    # Split the row range across 2 TensorCores where possible (v7x megacore);
    # on single-TC chips this outer "parallel" axis just runs sequentially.
    num_parallel = 2 if (blocks >= 2 and blocks % 2 == 0) else 1
    blocks_per_core = blocks // num_parallel

    kernel = functools.partial(_wbce_kernel, inv_n=1.0 / float(N),
                               single_log=bool(single_log))

    row_block = lambda c, i: (c * blocks_per_core + i, 0)

    out = pl.pallas_call(
        kernel,
        out_shape=jax.ShapeDtypeStruct((num_parallel * 8, 128), jnp.float32),
        grid_spec=pltpu.PrefetchScalarGridSpec(
            num_scalar_prefetch=0,
            grid=(num_parallel, blocks_per_core),
            in_specs=[
                pl.BlockSpec((tile_rows, L), row_block),
                pl.BlockSpec((tile_rows, L), row_block),
                pl.BlockSpec((1, L), lambda c, i: (0, 0)),
            ],
            out_specs=pl.BlockSpec((8, 128), lambda c, i: (c, 0)),
            scratch_shapes=[pltpu.VMEM((tile_rows, L), jnp.float32)],
        ),
        compiler_params=pltpu.CompilerParams(
            dimension_semantics=("parallel", "arbitrary"),
            vmem_limit_bytes=32 * 1024 * 1024,
        ),
    )(x2, t2, w2)

    # Each core broadcast its (already 1/N-scaled) partial across its (8, 128)
    # output block; pick one lane per core and sum the partials.
    return jnp.sum(out[::8, 0])


def _reference(inputs, targets, weights):
    x = inputs.reshape(-1).astype(jnp.float32)
    t = targets.reshape(-1).astype(jnp.float32)
    C = weights.shape[0]
    w_full = jnp.tile(jnp.asarray(weights, jnp.float32), x.shape[0] // C)
    log_x = jnp.maximum(jnp.log(x), -100.0)
    log_1mx = jnp.maximum(jnp.log(1.0 - x), -100.0)
    return jnp.mean(-w_full * (t * log_x + (1.0 - t) * log_1mx))


if __name__ == "__main__":
    beta = 0.9
    weights = compute_loss_weights(beta=beta)          # C = 4 class weights
    C = weights.shape[0]

    key = jax.random.PRNGKey(0)
    k1, k2 = jax.random.split(key)
    # inputs are probabilities (as expected by binary_cross_entropy)
    inputs = jax.random.uniform(k1, (2, C, 16, 16), jnp.float32,
                                minval=1e-4, maxval=1.0 - 1e-4)
    targets = (jax.random.uniform(k2, (2, C, 16, 16)) > 0.5).astype(jnp.float32)

    loss = weighted_bce_loss(inputs, targets, jnp.asarray(weights))
    loss = jax.block_until_ready(loss)

    ref = jax.block_until_ready(_reference(inputs, targets, jnp.asarray(weights)))
    assert np.allclose(np.asarray(loss), np.asarray(ref), rtol=1e-5, atol=1e-6), (
        loss, ref)

    print("KERNEL_OK")
</pallas_src>

<mosaic_0001>
module attributes {stable_mosaic.version = 11 : i64} {
  func.func @_wbce_kernel(%arg0: i32, %arg1: i32, %arg2: memref<4x512xf32, #tpu.memory_space<vmem>>, %arg3: memref<4x512xf32, #tpu.memory_space<vmem>>, %arg4: memref<1x512xf32, #tpu.memory_space<vmem>>, %arg5: memref<8x128xf32, #tpu.memory_space<vmem>>, %arg6: memref<4x512xf32, #tpu.memory_space<vmem>>) attributes {dimension_semantics = [#tpu.dimension_semantics<parallel>, #tpu.dimension_semantics<arbitrary>], iteration_bounds = array<i64: 1, 1>, scalar_prefetch = 0 : i64, scratch_operands = 1 : i64, tpu.core_type = #tpu.core_type<tc>, window_params = [{transform_indices = @transform_0, window_bounds = array<i64: 4, 512>}, {transform_indices = @transform_1, window_bounds = array<i64: 4, 512>}, {pipeline_mode = #tpu.pipeline_mode<synchronous>, transform_indices = @transform_2, window_bounds = array<i64: 1, 512>}, {transform_indices = @transform_3, window_bounds = array<i64: 8, 128>}]} {
    %c0_i32 = arith.constant 0 : i32
    %0 = arith.cmpi eq, %arg1, %c0_i32 : i32
    %1 = arith.extui %0 : i1 to i32
    %c0_i32_0 = arith.constant 0 : i32
    %2 = arith.cmpi ne, %1, %c0_i32_0 : i32
    scf.if %2 {
      %cst_16 = arith.constant 0.000000e+00 : f32
      %29 = vector.broadcast %cst_16 : f32 to vector<4x512xf32>
      %c0_17 = arith.constant 0 : index
      %c0_18 = arith.constant 0 : index
      %30 = vector.load %arg6[%c0_17, %c0_18] : memref<4x512xf32, #tpu.memory_space<vmem>>, vector<4x512xf32>
      tpu.vector_store %arg6[%c0_17, %c0_18], %29 {strides = array<i32>} : memref<4x512xf32, #tpu.memory_space<vmem>>, vector<4x512xf32>,
    } else {
    }
    %c0 = arith.constant 0 : index
    %c0_1 = arith.constant 0 : index
    %3 = vector.load %arg2[%c0, %c0_1] : memref<4x512xf32, #tpu.memory_space<vmem>>, vector<4x512xf32>
    %c0_2 = arith.constant 0 : index
    %c0_3 = arith.constant 0 : index
    %4 = vector.load %arg3[%c0_2, %c0_3] : memref<4x512xf32, #tpu.memory_space<vmem>>, vector<4x512xf32>
    %c0_4 = arith.constant 0 : index
    %c0_5 = arith.constant 0 : index
    %5 = vector.load %arg4[%c0_4, %c0_5] : memref<1x512xf32, #tpu.memory_space<vmem>>, vector<1x512xf32>
    %6 = math.log %3 : vector<4x512xf32>
    %cst = arith.constant -1.000000e+02 : f32
    %7 = vector.broadcast %cst : f32 to vector<4x512xf32>
    %8 = arith.maximumf %6, %7 : vector<4x512xf32>
    %cst_6 = arith.constant 1.000000e+00 : f32
    %9 = vector.broadcast %cst_6 : f32 to vector<4x512xf32>
    %10 = arith.subf %9, %3 : vector<4x512xf32>
    %11 = math.log %10 : vector<4x512xf32>
    %cst_7 = arith.constant -1.000000e+02 : f32
    %12 = vector.broadcast %cst_7 : f32 to vector<4x512xf32>
    %13 = arith.maximumf %11, %12 : vector<4x512xf32>
    %cst_8 = arith.constant 0.000000e+00 : f32
    %14 = vector.broadcast %cst_8 : f32 to vector<1x512xf32>
    %15 = arith.subf %14, %5 : vector<1x512xf32>
    %16 = arith.mulf %4, %8 : vector<4x512xf32>
    %cst_9 = arith.constant 1.000000e+00 : f32
    %17 = vector.broadcast %cst_9 : f32 to vector<4x512xf32>
    %18 = arith.subf %17, %4 : vector<4x512xf32>
    %19 = arith.mulf %18, %13 : vector<4x512xf32>
    %20 = arith.addf %16, %19 : vector<4x512xf32>
    %21 = vector.broadcast %15 : vector<1x512xf32> to vector<4x512xf32>
    %22 = arith.mulf %21, %20 : vector<4x512xf32>
    %c0_10 = arith.constant 0 : index
    %c0_11 = arith.constant 0 : index
    %23 = vector.load %arg6[%c0_10, %c0_11] : memref<4x512xf32, #tpu.memory_space<vmem>>, vector<4x512xf32>
    %24 = arith.addf %23, %22 : vector<4x512xf32>
    %c0_12 = arith.constant 0 : index
    %c0_13 = arith.constant 0 : index
    %25 = vector.load %arg6[%c0_12, %c0_13] : memref<4x512xf32, #tpu.memory_space<vmem>>, vector<4x512xf32>
    tpu.vector_store %arg6[%c0_12, %c0_13], %24 {strides = array<i32>} : memref<4x512xf32, #tpu.memory_space<vmem>>, vector<4x512xf32>,
    %c0_i32_14 = arith.constant 0 : i32
    %26 = arith.cmpi eq, %arg1, %c0_i32_14 : i32
    %27 = arith.extui %26 : i1 to i32
    %c0_i32_15 = arith.constant 0 : i32
    %28 = arith.cmpi ne, %27, %c0_i32_15 : i32
    scf.if %28 {
      %c0_16 = arith.constant 0 : index
      %c0_17 = arith.constant 0 : index
      %29 = vector.load %arg6[%c0_16, %c0_17] : memref<4x512xf32, #tpu.memory_space<vmem>>, vector<4x512xf32>
      %30 = vector.shape_cast %29 : vector<4x512xf32> to vector<1x4x512xf32>
      %cst_18 = arith.constant dense<0.000000e+00> : vector<1xf32>
      %31 = vector.multi_reduction <add>, %30, %cst_18 [1, 2] : vector<1x4x512xf32> to vector<1xf32>
      %32 = vector.shape_cast %31 : vector<1xf32> to vector<1x1x1xf32>
      %33 = vector.extract %32[0, 0, 0] : f32 from vector<1x1x1xf32>
      %cst_19 = arith.constant 4.8828125E-4 : f32
      %34 = arith.mulf %33, %cst_19 : f32
      %cst_20 = arith.constant 0.000000e+00 : f32
      %35 = vector.broadcast %cst_20 : f32 to vector<8x128xf32>
      %36 = vector.broadcast %34 : f32 to vector<8x128xf32>
      %37 = arith.addf %35, %36 : vector<8x128xf32>
      %c0_21 = arith.constant 0 : index
      %c0_22 = arith.constant 0 : index
      %38 = vector.load %arg5[%c0_21, %c0_22] : memref<8x128xf32, #tpu.memory_space<vmem>>, vector<8x128xf32>
      tpu.vector_store %arg5[%c0_21, %c0_22], %37 {strides = array<i32>} : memref<8x128xf32, #tpu.memory_space<vmem>>, vector<8x128xf32>,
    } else {
    }
    return
  }
  func.func @transform_0(%arg0: i32, %arg1: i32) -> (i32, i32) {
    %c1_i32 = arith.constant 1 : i32
    %0 = arith.muli %arg0, %c1_i32 : i32
    %1 = arith.addi %0, %arg1 : i32
    %c0_i32 = arith.constant 0 : i32
    %c0_i32_0 = arith.constant 0 : i32
    return %1, %c0_i32 : i32, i32
  }
  func.func @transform_1(%arg0: i32, %arg1: i32) -> (i32, i32) {
    %c1_i32 = arith.constant 1 : i32
    %0 = arith.muli %arg0, %c1_i32 : i32
    %1 = arith.addi %0, %arg1 : i32
    %c0_i32 = arith.constant 0 : i32
    %c0_i32_0 = arith.constant 0 : i32
    return %1, %c0_i32 : i32, i32
  }
  func.func @transform_2(%arg0: i32, %arg1: i32) -> (i32, i32) {
    %c0_i32 = arith.constant 0 : i32
    %c0_i32_0 = arith.constant 0 : i32
    %c0_i32_1 = arith.constant 0 : i32
    return %c0_i32, %c0_i32_0 : i32, i32
  }
  func.func @transform_3(%arg0: i32, %arg1: i32) -> (i32, i32) {
    %c0_i32 = arith.constant 0 : i32
    %c0_i32_0 = arith.constant 0 : i32
    return %arg0, %c0_i32 : i32, i32
  }
}

</mosaic_0001>

<bundles_post_ra>
// kernel: tpu_custom_call.1
= control target key start
LH: loop header
LB: loop body
LE: loop exit
PB: predicated region body
PF: predicated region fallthrough
CT: control target
= control target key end

     0   :  { %8 = vsyncpa [#allocation4], 0  ;;  %s325_s0 = inlined_call_operand.hbm [shape: f32[4,512], index: 0, kind: input, shape index: {}]   ;;  %s326_s1 = inlined_call_operand.hbm [shape: f32[4,512], index: 1, kind: input, shape index: {}]   ;;  %s327_s2 = inlined_call_operand.vmem [shape: f32[1,512], index: 2, kind: input, shape index: {}]   ;;  %s328_s3 = inlined_call_operand.hbm [shape: f32[8,128], index: 3, kind: output, shape index: {}]  }
   0x1   :  { %9 = vsyncpa [#allocation7], 0 }
   0x2   :  { %10 = vsyncpa [#allocation5], 0  ;;  %s263_s12 = smov [#allocation3]   ;;  %s264_s14 = smov [#allocation6]  }
   0x3   :  { %s21_s13 = sshll.u32 %s263_s12, 4  ;;  %s35_s15 = sshll.u32 %s264_s14, 4  ;;  %s22_s13 = int_to_ptr.vmem [resolvable:$true] %s21_s13  ;;  %s36_s15 = int_to_ptr.vmem [resolvable:$true] %s35_s15 }
   0x4   :  { %s191_s18 = scalar_lea.hbm %s325_s0, 256 }
   0x5   :  { %p192_p0 = scmp.ne.s32.totalorder %s325_s0, %s191_s18  ;;  %p195_p1 = scmp.lt.u32.totalorder %s191_s18, %s325_s0 }
   0x7   :  { %p197_p2 = pnand %p195_p1, %p192_p0 }
   0x9   :  { %200 = shalt.err (!%p197_p2)
}
   0xa   :  { %s201_s23 = scalar_lea.vmem %s22_s13, 256  ;;  %p206_p4 = scmp.lt.s32.totalorder %s22_s13, %s22_s13 }
   0xb   :  { %p202_p3 = scmp.ne.s32.totalorder %s22_s13, %s201_s23  ;;  %p207_p5 = scmp.lt.s32.totalorder %s201_s23, %s201_s23 }
   0xd   :  { %p208_p6 = por %p207_p5, %p206_p4 }
   0xf   :  { %p209_p7 = pnand %p208_p6, %p202_p3 }
  0x11   :  { %212 = shalt.err (!%p209_p7)
}
  0x12   :  { %24 = dma.hbm_to_vmem [thread:$0]  %s325_s0, 256, %s22_s13, [#allocation4]  }
  0x13   :  { %s213_s28 = scalar_lea.hbm %s326_s1, 256 }
  0x14   :  { %p214_p8 = scmp.ne.s32.totalorder %s326_s1, %s213_s28  ;;  %p217_p9 = scmp.lt.u32.totalorder %s213_s28, %s326_s1 }
  0x16   :  { %p219_p10 = pnand %p217_p9, %p214_p8 }
  0x18   :  { %222 = shalt.err (!%p219_p10)
}
  0x19   :  { %s223_s6 = scalar_lea.vmem %s36_s15, 256  ;;  %p228_p12 = scmp.lt.s32.totalorder %s36_s15, %s36_s15 }
  0x1a   :  { %p224_p11 = scmp.ne.s32.totalorder %s36_s15, %s223_s6  ;;  %p229_p13 = scmp.lt.s32.totalorder %s223_s6, %s223_s6 }
  0x1c   :  { %p230_p0 = por %p229_p13, %p228_p12 }
  0x1e   :  { %p231_p1 = pnand %p230_p0, %p224_p11 }
  0x20   :  { %234 = shalt.err (!%p231_p1)
}
  0x21   :  { %38 = dma.hbm_to_vmem [thread:$0]  %s326_s1, 256, %s36_s15, [#allocation7]  }
  0x22   :  { %257 = dma.done.wait [#allocation4], 256  }
  0x23   :  { %258 = vsyncadd [#allocation4], 4294967040 }
  0x24   :  { %259 = dma.done.wait [#allocation7], 256  }
  0x25   :  { %260 = vsyncadd [#allocation7], 4294967040  ;;  %v55_v0 = vld [vmem:[#allocation3] sm:$0xff]  ;;  %v56_v1 = vld [vmem:[#allocation3 + $0x8] sm:$0xff]  ;;  %v84_v4 = vlaneseq  ;;  %vm139_vm0 = vcmask 1043456   ;;  %s265_s1 = smov [#allocation8]  }
  0x26   :  { %183 = vlog2.f32 %v55_v0  ;;  %v66_v2 = vsub.f32 1.0, %v55_v0  ;;  %v67_v3 = vsub.f32 1.0, %v56_v1  ;;  %v57_v7 = vld [vmem:[#allocation6] sm:$0xff]  ;;  %v59_v8 = vld [vmem:[%s327_s2] sm:$0xf]  ;;  %v58_v10 = vld [vmem:[#allocation6 + $0x8] sm:$0xff] }
  0x27   :  { %185 = vlog2.f32 %v56_v1  ;;  %v85_v5 = vshrl.u32 %v84_v4, 7  ;;  %v74_v18 = vsub.f32 0.0, %v59_v8  ;;  %v77_v19 = vsub.f32 1.0, %v57_v7  ;;  %s166_s2 = sshll.u32 %s265_s1, 4  ;;  %s167_s2 = int_to_ptr.vmem [resolvable:$true] %s166_s2 }
  0x28   :  { %187 = vlog2.f32 %v66_v2  ;;  %v78_v22 = vsub.f32 1.0, %v58_v10  ;;  %s235_s12 = scalar_lea.vmem %s167_s2, 128  ;;  %p240_p3 = scmp.lt.s32.totalorder %s167_s2, %s167_s2 }
  0x29   :  { %189 = vlog2.f32 %v67_v3  ;;  %v86_v14 = vsub.s32 0, %v85_v5  ;;  %v94_v23 = vsub.s32 2, %v85_v5  ;;  %v90_v26 = vsub.s32 1, %v85_v5  ;;  %p236_p2 = scmp.ne.s32.totalorder %s167_s2, %s235_s12  ;;  %p241_p4 = scmp.lt.s32.totalorder %s235_s12, %s235_s12 }
  0x2a   :  { %v98_v29 = vsub.s32 3, %v85_v5 }
  0x2b   :  { %v87_v31 = vrot.slane %v74_v18, %v86_v14  ;;  %v95_v33 = vrot.slane %v74_v18, %v94_v23  ;;  %v91_v35 = vrot.slane %v74_v18, %v90_v26  ;;  %p242_p5 = por %p241_p4, %p240_p3 }
  0x2c   :  { %v99_v37 = vrot.slane %v74_v18, %v98_v29 }
  0x2d   :  { %p243_p6 = pnand %p242_p5, %p236_p2 }
  0x30   :  { %v184_v6 = vpop.eup %183 }
  0x31   :  { %v186_v9 = vpop.eup %185  ;;  %v61_v11 = vmul.f32 0.6931472, %v184_v6 }
  0x32   :  { %v188_v12 = vpop.eup %187  ;;  %v63_v13 = vmul.f32 0.6931472, %v186_v9 }
  0x33   :  { %v190_v15 = vpop.eup %189  ;;  %v64_v16 = vmax.f32 %v61_v11, -100.0  ;;  %v69_v17 = vmul.f32 0.6931472, %v188_v12 }
  0x34   :  { %v65_v20 = vmax.f32 %v63_v13, -100.0  ;;  %v71_v21 = vmul.f32 0.6931472, %v190_v15 }
  0x35   :  { %v72_v24 = vmax.f32 %v69_v17, -100.0  ;;  %v75_v25 = vmul.f32 %v64_v16, %v57_v7 }
  0x36   :  { %v73_v27 = vmax.f32 %v71_v21, -100.0  ;;  %v76_v28 = vmul.f32 %v65_v20, %v58_v10 }
  0x37   :  { %v79_v30 = vmul.f32 %v77_v19, %v72_v24 }
  0x38   :  { %v80_v32 = vmul.f32 %v78_v22, %v73_v27 }
  0x39   :  { %v81_v34 = vadd.f32 %v79_v30, %v75_v25 }
  0x3a   :  { %v82_v36 = vadd.f32 %v80_v32, %v76_v28 }
  0x3b   :  { %v106_v38 = vcombine.high %v81_v34, %v81_v34  ;;  %v110_v39 = vmul.f32 %v87_v31, %v81_v34 }
  0x3c   :  { %v107_v40 = vcombine.high %v82_v36, %v82_v36  ;;  %v112_v41 = vmul.f32 %v95_v33, %v82_v36 }
  0x3d   :  { %v111_v42 = vmul.f32 %v106_v38, %v91_v35 }
  0x3e   :  { %v113_v43 = vmul.f32 %v107_v40, %v99_v37 }
  0x3f   :  { %v120_v44 = vcombine.low %v110_v39, %v111_v42  ;;  %v176_v45 = vcombine.low %v111_v42, %v111_v42 }
  0x40   :  { %v121_v46 = vcombine.low %v112_v41, %v113_v43  ;;  %v177_v47 = vcombine.low %v113_v43, %v113_v43 }
  0x41   :  { %v140_v48 = vsel %vm139_vm0, %v120_v44, 0.0  ;;  %v141_v49 = vsel %vm139_vm0, %v176_v45, 0.0 }
  0x42   :  { %v142_v50 = vadd.f32 %v141_v49, %v140_v48  ;;  %v143_v51 = vsel %vm139_vm0, %v121_v46, 0.0  ;;  %v145_v52 = vsel %vm139_vm0, %v177_v47, 0.0 }
  0x44   :  { %v144_v53 = vadd.f32 %v143_v51, %v142_v50 }
  0x46   :  { %v146_v54 = vadd.f32 %v145_v52, %v144_v53 }
  0x48   :  { %147 = vadd.xlane.f32.xlu0 %v146_v54 }
  0xd5   :  { %v148_v55 = vpop.xlane.xlu0 %147 }
  0xd6   :  { %v149_v56 = vrot.slane %v148_v55, 4 }
  0xd8   :  { %v150_v57 = vadd.f32 %v149_v56, %v148_v55 }
  0xda   :  { %v151_v58 = vrot.slane %v150_v57, 2 }
  0xdc   :  { %v152_v59 = vadd.f32 %v151_v58, %v150_v57 }
  0xde   :  { %v153_v60 = vrot.slane %v152_v59, 1 }
  0xe0   :  { %v154_v61 = vadd.f32 %v153_v60, %v152_v59 }
  0xe2   :  { %178 = vpush %v154_v61 }
 0x113   :  { %s179_s10 = spop %178 }
 0x114   :  { %s156_s11 = smul.f32 0.00048828125, %s179_s10 }
 0x116   :  { %v157_v62 = vstv %s156_s11 }
 0x117   :  { %159 = vst [vmem:[#allocation8] sm:$0xff] %v157_v62 }
 0x118   :  { %246 = shalt.err (!%p243_p6)
}
 0x119   :  { %s247_s15 = scalar_lea.hbm %s328_s3, 128 }
 0x11a   :  { %p248_p7 = scmp.ne.s32.totalorder %s328_s3, %s247_s15  ;;  %p251_p8 = scmp.lt.u32.totalorder %s247_s15, %s328_s3 }
 0x11c   :  { %p253_p9 = pnand %p251_p8, %p248_p7 }
 0x11e   :  { %256 = shalt.err (!%p253_p9)
}
 0x11f   :  { %169 = dma.vmem_to_hbm [thread:$0]  %s167_s2, 128, %s328_s3, [#allocation5]  }
 0x120   :  { %261 = dma.done.wait [#allocation5], 128  }
 0x121   :  { %262 = vsyncadd [#allocation5], 4294967168 }
 0x122   :  { %173 = vsyncpa [#allocation4], 1 }
 0x123   :  { %174 = vsyncpa [#allocation7], 1 }
 0x124   :  { %175 = vsyncpa [#allocation5], 1 }

</bundles_post_ra>
